<compile_context>
chip_gen: v5e
topology: v5e:2x2
jax: 0.10.0
libtpu: 0.0.40
codegen_flags: <defaults>
</compile_context>

<pallas_src>
import functools

import jax
import jax.numpy as jnp
from jax.experimental import pallas as pl
from jax.experimental.pallas import tpu as pltpu
from jax.scipy.linalg import block_diag


# ----------------------- packed-parameter buffer layout ----------------------
def _pack_layout(B, H, f0):
    """Static row layout of the packed parameter buffer (Python ints only)."""
    def up8(n):
        return ((n + 7) // 8) * 8

    entries = [
        ("W1_blk", 3 * B, B * H),   # block-diag of w1 (3,H), B copies
        ("b1_t",   1,     B * H),   # tiled b1
        ("W2_blk", B * H, 3 * B),   # block-diag of w2 (H,3), B copies
        ("b2_t",   1,     3 * B),   # tiled b2
        ("linw_t", f0,    3 * B),   # lane-tiled Linear weight
        ("seg",    3 * B, B),       # lane-group (3 per batch) sum matrix
        ("lin_b",  1,     1),       # Linear bias scalar
    ]
    layout = {}
    r = 0
    for name, nr, nc in entries:
        layout[name] = (r, nr, nc)
        r += up8(nr)
    n_rows = up8(r)
    n_cols = max(128, ((max(nc for _, _, nc in entries) + 127) // 128) * 128)
    return layout, n_rows, n_cols


# ----------------------------- Pallas kernel --------------------------------
def _disc_kernel(x_ref, wstk_ref, p_ref, y_ref, prob_ref, *, B, H, f0):
    layout, _, _ = _pack_layout(B, H, f0)
    hi = jax.lax.Precision.HIGHEST

    def param(name):
        r0, nr, nc = layout[name]
        return p_ref[r0:r0 + nr, 0:nc]          # static ref slices -> free

    # Lane-fused activations: X[:, 3*b + c] = x[b, :, c].
    X = jnp.concatenate([x_ref[b] for b in range(B)], axis=1)       # (N, 3B)

    # One stacked spectral matmul.  Rows [0:f0] already carry the folded
    # eigenvalue-prior scale (scale * phi^T); rows [f0:2f0] are the learned W.
    proj = jnp.dot(wstk_ref[...], X, preferred_element_type=jnp.float32,
                   precision=hi)                                    # (2f0, 3B)
    s_scaled = proj[:f0, :]                                         # (f0, 3B)
    g_all = proj[f0:, :]                                            # (f0, 3B)

    # Pointwise xyz-MLP, block-diagonal over the batch: two MXU dots.
    h_all = jnp.tanh(
        jnp.dot(g_all, param("W1_blk"), preferred_element_type=jnp.float32,
                precision=hi) + param("b1_t"))                      # (f0, B*H)
    g2_all = jnp.dot(h_all, param("W2_blk"),
                     preferred_element_type=jnp.float32,
                     precision=hi) + param("b2_t")                  # (f0, 3B)

    # Eigenvalue-prior skip combination; one full-block store.
    y_all = s_scaled + g2_all                                       # (f0, 3B)
    y_ref[...] = y_all.astype(y_ref.dtype)

    # Linear(f0*3 -> 1) on the lane-fused slab: fused mul + sublane reduce,
    # then a tiny (1,3B)x(3B,B) segment matmul groups the 3 xyz lanes / batch.
    col = jnp.sum(y_all * param("linw_t"), axis=0, keepdims=True)   # (1, 3B)
    z = jnp.dot(col, param("seg"), preferred_element_type=jnp.float32,
                precision=hi) + param("lin_b")                      # (1, B)
    # numerically safe sigmoid: 0.5 * (1 + tanh(z / 2))
    prob_ref[...] = 0.5 * (jnp.tanh(0.5 * z) + 1.0)


# ------------------------------ wrapper --------------------------------------
def discriminator_forward(x, w_stacked, packed, *, hidden_dim):
    B, N, _ = x.shape
    f0 = w_stacked.shape[0] // 2

    kernel = functools.partial(_disc_kernel, B=B, H=hidden_dim, f0=f0)
    vmem = pl.BlockSpec(memory_space=pltpu.MemorySpace.VMEM)

    y_all, probs_1b = pl.pallas_call(
        kernel,
        out_shape=(
            jax.ShapeDtypeStruct((f0, 3 * B), jnp.float32),  # lane-fused y
            jax.ShapeDtypeStruct((1, B), jnp.float32),       # sigmoid(logits)
        ),
        in_specs=[vmem, vmem, vmem],
        out_specs=(vmem, vmem),
    )(x, w_stacked, packed)

    # Tiny relayouts fused into the single jitted dispatch.
    x_flat = y_all.reshape(f0, B, 3).transpose(1, 0, 2).reshape(B, f0 * 3)
    probs = probs_1b.reshape(B, 1)
    return probs, x_flat


# ------------------------------ parameter setup ------------------------------
def make_params(key, N, f0, H, B, *, prior_coef):
    k_eig, k_w, k_w1, k_w2, k_lw, k_lb = jax.random.split(key, 6)

    # synthetic orthonormal "eigenvectors" + ascending "eigenvalues"
    q, _ = jnp.linalg.qr(jax.random.normal(k_eig, (N, N), dtype=jnp.float32))
    eig_vecs = q
    eig_vals = jnp.linspace(0.0, 2.0, N, dtype=jnp.float32)

    phi_T = eig_vecs[:, :f0].T                                    # (f0, N)
    W = phi_T + 0.01 * jax.random.normal(k_w, (f0, N), dtype=jnp.float32)

    w1 = 0.1 * jax.random.normal(k_w1, (3, H), dtype=jnp.float32)
    b1 = jnp.zeros((1, H), dtype=jnp.float32)
    w2 = 0.1 * jax.random.normal(k_w2, (H, 3), dtype=jnp.float32)
    b2 = jnp.zeros((1, 3), dtype=jnp.float32)

    scale = (prior_coef / (1.0 + eig_vals[:f0])).reshape(f0, 1)   # prior/(1+λ)

    lin_w = 0.1 * jax.random.normal(k_lw, (f0 * 3,), dtype=jnp.float32)
    lin_b = 0.1 * jax.random.normal(k_lb, (1, 1), dtype=jnp.float32)

    # ---------- one-time packing / folding of the kernel operands ----------
    # prior scale folded into the fixed spectral rows -> one stacked MXU LHS
    w_stacked = jnp.concatenate([scale * phi_T, W], axis=0)       # (2f0, N)

    layout, n_rows, n_cols = _pack_layout(B, H, f0)
    vals = {
        "W1_blk": block_diag(*([w1] * B)),                               # (3B, B*H)
        "b1_t": jnp.tile(b1, (1, B)),                                    # (1, B*H)
        "W2_blk": block_diag(*([w2] * B)),                               # (B*H, 3B)
        "b2_t": jnp.tile(b2, (1, B)),                                    # (1, 3B)
        "linw_t": jnp.tile(lin_w.reshape(f0, 3), (1, B)),                # (f0, 3B)
        "seg": jnp.repeat(jnp.eye(B, dtype=jnp.float32), 3, axis=0),     # (3B, B)
        "lin_b": lin_b,                                                  # (1, 1)
    }
    packed = jnp.zeros((n_rows, n_cols), dtype=jnp.float32)
    for name, (r0, nr, nc) in layout.items():
        packed = packed.at[r0:r0 + nr, 0:nc].set(vals[name])

    return dict(phi_T=phi_T, W=W, w1=w1, b1=b1, w2=w2, b2=b2, scale=scale,
                lin_w=lin_w, lin_b=lin_b, w_stacked=w_stacked, packed=packed)


# ------------------------------ pure-JAX reference ---------------------------
def _reference(x, params):
    hi = jax.lax.Precision.HIGHEST
    s = jnp.einsum('fn,bnc->bfc', params["phi_T"], x, precision=hi)
    g = jnp.einsum('fn,bnc->bfc', params["W"], x, precision=hi)
    h = jnp.tanh(jnp.einsum('bfc,ch->bfh', g, params["w1"], precision=hi)
                 + params["b1"])
    g2 = jnp.einsum('bfh,hc->bfc', h, params["w2"], precision=hi) + params["b2"]
    y = params["scale"][None, :, :] * s + g2
    x_flat = y.reshape(x.shape[0], -1)
    z = x_flat @ params["lin_w"].reshape(-1, 1) + params["lin_b"]
    return jax.nn.sigmoid(z), x_flat


if __name__ == "__main__":
    B, N, f0, H = 2, 64, 16, 32       # batch, mesh vertices, nb_freq[0], hidden
    prior_coef = 0.5

    key = jax.random.PRNGKey(0)
    k_x, k_p = jax.random.split(key)
    x = jax.random.normal(k_x, (B, N, 3), dtype=jnp.float32)
    params = make_params(k_p, N, f0, H, B, prior_coef=prior_coef)

    fwd = jax.jit(discriminator_forward, static_argnames=("hidden_dim",))
    probs, x_flat = fwd(x, params["w_stacked"], params["packed"], hidden_dim=H)
    jax.block_until_ready((probs, x_flat))

    assert probs.shape == (B, 1)
    assert x_flat.shape == (B, f0 * 3)
    assert bool(jnp.all(jnp.isfinite(probs)))
    assert bool(jnp.all(jnp.isfinite(x_flat)))

    ref_probs, ref_flat = _reference(x, params)
    assert float(jnp.max(jnp.abs(probs - ref_probs))) < 1e-2
    assert float(jnp.max(jnp.abs(x_flat - ref_flat))) < 1e-2

    print("KERNEL_OK")
</pallas_src>

<mosaic_0001>
module attributes {stable_mosaic.version = 11 : i64} {
  func.func @_disc_kernel(%arg0: memref<2x64x3xf32, #tpu.memory_space<vmem>>, %arg1: memref<32x64xf32, #tpu.memory_space<vmem>>, %arg2: memref<120x128xf32, #tpu.memory_space<vmem>>, %arg3: memref<16x6xf32, #tpu.memory_space<vmem>>, %arg4: memref<1x2xf32, #tpu.memory_space<vmem>>) attributes {dimension_semantics = [], scalar_prefetch = 0 : i64, scratch_operands = 0 : i64, tpu.core_type = #tpu.core_type<tc>} {
    %c0 = arith.constant 0 : index
    %c0_0 = arith.constant 0 : index
    %c0_1 = arith.constant 0 : index
    %0 = vector.load %arg0[%c0, %c0_0, %c0_1] : memref<2x64x3xf32, #tpu.memory_space<vmem>>, vector<1x64x3xf32>
    %1 = vector.shape_cast %0 : vector<1x64x3xf32> to vector<64x3xf32>
    %c1 = arith.constant 1 : index
    %c0_2 = arith.constant 0 : index
    %c0_3 = arith.constant 0 : index
    %2 = vector.load %arg0[%c1, %c0_2, %c0_3] : memref<2x64x3xf32, #tpu.memory_space<vmem>>, vector<1x64x3xf32>
    %3 = vector.shape_cast %2 : vector<1x64x3xf32> to vector<64x3xf32>
    %4 = tpu.concatenate %1, %3 in 1 : vector<64x3xf32>, vector<64x3xf32> -> vector<64x6xf32>
    %c0_4 = arith.constant 0 : index
    %c0_5 = arith.constant 0 : index
    %5 = vector.load %arg1[%c0_4, %c0_5] : memref<32x64xf32, #tpu.memory_space<vmem>>, vector<32x64xf32>
    %cst = arith.constant dense<0.000000e+00> : vector<32x6xf32>
    %6 = tpu.matmul %5, %4, %cst {dimension_numbers = #tpu.dot_dimension_numbers<[1], [0], [0], [1], [0, 0, 1, 1], [], []>, precision = #tpu.contract_precision<fp32>} : vector<32x64xf32>, vector<64x6xf32>, vector<32x6xf32> -> vector<32x6xf32>
    %7 = vector.extract_strided_slice %6 {offsets = [0, 0], sizes = [16, 6], strides = [1, 1]} : vector<32x6xf32> to vector<16x6xf32>
    %8 = vector.extract_strided_slice %6 {offsets = [16, 0], sizes = [16, 6], strides = [1, 1]} : vector<32x6xf32> to vector<16x6xf32>
    %c0_6 = arith.constant 0 : index
    %c0_7 = arith.constant 0 : index
    %9 = vector.load %arg2[%c0_6, %c0_7] : memref<120x128xf32, #tpu.memory_space<vmem>>, vector<6x64xf32>
    %cst_8 = arith.constant dense<0.000000e+00> : vector<16x64xf32>
    %10 = tpu.matmul %8, %9, %cst_8 {dimension_numbers = #tpu.dot_dimension_numbers<[1], [0], [0], [1], [0, 0, 1, 1], [], []>, precision = #tpu.contract_precision<fp32>} : vector<16x6xf32>, vector<6x64xf32>, vector<16x64xf32> -> vector<16x64xf32>
    %c8 = arith.constant 8 : index
    %c0_9 = arith.constant 0 : index
    %11 = vector.load %arg2[%c8, %c0_9] : memref<120x128xf32, #tpu.memory_space<vmem>>, vector<1x64xf32>
    %12 = vector.broadcast %11 : vector<1x64xf32> to vector<16x64xf32>
    %13 = arith.addf %10, %12 : vector<16x64xf32>
    %14 = math.tanh %13 : vector<16x64xf32>
    %c16 = arith.constant 16 : index
    %c0_10 = arith.constant 0 : index
    %15 = vector.load %arg2[%c16, %c0_10] : memref<120x128xf32, #tpu.memory_space<vmem>>, vector<64x6xf32>
    %cst_11 = arith.constant dense<0.000000e+00> : vector<16x6xf32>
    %16 = tpu.matmul %14, %15, %cst_11 {dimension_numbers = #tpu.dot_dimension_numbers<[1], [0], [0], [1], [0, 0, 1, 1], [], []>, precision = #tpu.contract_precision<fp32>} : vector<16x64xf32>, vector<64x6xf32>, vector<16x6xf32> -> vector<16x6xf32>
    %c80 = arith.constant 80 : index
    %c0_12 = arith.constant 0 : index
    %17 = vector.load %arg2[%c80, %c0_12] : memref<120x128xf32, #tpu.memory_space<vmem>>, vector<1x6xf32>
    %18 = vector.broadcast %17 : vector<1x6xf32> to vector<16x6xf32>
    %19 = arith.addf %16, %18 : vector<16x6xf32>
    %20 = arith.addf %7, %19 : vector<16x6xf32>
    %c0_13 = arith.constant 0 : index
    %c0_14 = arith.constant 0 : index
    %21 = vector.load %arg3[%c0_13, %c0_14] : memref<16x6xf32, #tpu.memory_space<vmem>>, vector<16x6xf32>
    tpu.vector_store %arg3[%c0_13, %c0_14], %20 {strides = array<i32>} : memref<16x6xf32, #tpu.memory_space<vmem>>, vector<16x6xf32>,
    %c88 = arith.constant 88 : index
    %c0_15 = arith.constant 0 : index
    %22 = vector.load %arg2[%c88, %c0_15] : memref<120x128xf32, #tpu.memory_space<vmem>>, vector<16x6xf32>
    %23 = arith.mulf %20, %22 : vector<16x6xf32>
    %cst_16 = arith.constant dense<0.000000e+00> : vector<6xf32>
    %24 = vector.multi_reduction <add>, %23, %cst_16 [0] : vector<16x6xf32> to vector<6xf32>
    %25 = vector.shape_cast %24 : vector<6xf32> to vector<1x6xf32>
    %c104 = arith.constant 104 : index
    %c0_17 = arith.constant 0 : index
    %26 = vector.load %arg2[%c104, %c0_17] : memref<120x128xf32, #tpu.memory_space<vmem>>, vector<6x2xf32>
    %cst_18 = arith.constant dense<0.000000e+00> : vector<1x2xf32>
    %27 = tpu.matmul %25, %26, %cst_18 {dimension_numbers = #tpu.dot_dimension_numbers<[1], [0], [0], [1], [0, 0, 1, 1], [], []>, precision = #tpu.contract_precision<fp32>} : vector<1x6xf32>, vector<6x2xf32>, vector<1x2xf32> -> vector<1x2xf32>
    %c112 = arith.constant 112 : index
    %c0_19 = arith.constant 0 : index
    %28 = vector.load %arg2[%c112, %c0_19] : memref<120x128xf32, #tpu.memory_space<vmem>>, vector<1x1xf32>
    %29 = vector.broadcast %28 : vector<1x1xf32> to vector<1x2xf32>
    %30 = arith.addf %27, %29 : vector<1x2xf32>
    %cst_20 = arith.constant 5.000000e-01 : f32
    %31 = vector.broadcast %cst_20 : f32 to vector<1x2xf32>
    %32 = arith.mulf %31, %30 : vector<1x2xf32>
    %33 = math.tanh %32 : vector<1x2xf32>
    %cst_21 = arith.constant 1.000000e+00 : f32
    %34 = vector.broadcast %cst_21 : f32 to vector<1x2xf32>
    %35 = arith.addf %33, %34 : vector<1x2xf32>
    %cst_22 = arith.constant 5.000000e-01 : f32
    %36 = vector.broadcast %cst_22 : f32 to vector<1x2xf32>
    %37 = arith.mulf %36, %35 : vector<1x2xf32>
    %c0_23 = arith.constant 0 : index
    %c0_24 = arith.constant 0 : index
    %38 = vector.load %arg4[%c0_23, %c0_24] : memref<1x2xf32, #tpu.memory_space<vmem>>, vector<1x2xf32>
    tpu.vector_store %arg4[%c0_23, %c0_24], %37 {strides = array<i32>} : memref<1x2xf32, #tpu.memory_space<vmem>>, vector<1x2xf32>,
    return
  }
}

</mosaic_0001>

<bundles_post_ra>
// kernel: discriminator_forward.1
= control target key start
LH: loop header
LB: loop body
LE: loop exit
PB: predicated region body
PF: predicated region fallthrough
CT: control target
= control target key end

     0   :  { %10 = vsyncpa [#allocation3], 0  ;;  %s1548_s0 = inlined_call_operand.vmem [shape: f32[2,64,3], index: 0, kind: input, shape index: {}]   ;;  %s1549_s1 = inlined_call_operand.hbm [shape: f32[32,64], index: 1, kind: input, shape index: {}]   ;;  %s1550_s2 = inlined_call_operand.vmem [shape: f32[120,128], index: 2, kind: input, shape index: {}]   ;;  %s1551_s3 = inlined_call_operand.vmem [shape: f32[16,6], index: 3, kind: output, shape index: {0}]   ;;  %s1552_s4 = inlined_call_operand.hbm [shape: f32[1,2], index: 4, kind: output, shape index: {1}]  }
   0x1   :  { %11 = vsyncpa [#allocation4], 0  ;;  %s18_s17 = sshll.u32 %s1549_s1, 4  ;;  %s1194_s18 = smov [#allocation2]   ;;  %s19_s17 = int_to_ptr.hbm [resolvable:$true] %s18_s17 }
   0x2   :  { %s20_s19 = sshll.u32 %s1194_s18, 4  ;;  %s1195_s20 = smov 128   ;;  %s21_s19 = int_to_ptr.vmem [resolvable:$true] %s20_s19 }
   0x3   :  { %s1196_s21 = smov 8  }
   0x4   :  { %26 = dma.hbm_to_vmem [thread:$0]  %s19_s17, 512, %s21_s19, [#allocation3], %s1195_s20, %s1195_s20, %s1196_s21  }
   0x5   :  { %1190 = dma.done.wait [#allocation3], 512  }
   0x6   :  { %1191 = vsyncadd [#allocation3], 4294966784  ;;  %v1125_v0 = vld [vmem:[%s1548_s0 + $0x78] sm:$0xff]  ;;  %v1123_v1 = vld [vmem:[%s1548_s0 + $0x68] sm:$0xff]  ;;  %s1197_s26 = smov 3   ;;  %vm82_vm0 = vcmask 23552  }
   0x7   :  { %72 = vrot.lane.b32.xlu0 %v1125_v0, %s1197_s26  ;;  %68 = vrot.lane.b32.xlu1 %v1123_v1, %s1197_s26  ;;  %v1121_v2 = vld [vmem:[%s1548_s0 + $0x58] sm:$0xff]  ;;  %v1124_v3 = vld [vmem:[%s1548_s0 + $0x70] sm:$0xff]  ;;  %v91_v11 = vld [vmem:[#allocation2] sm:$0xff]  ;;  %vm95_vm1 = vcmask 523264   ;;  %vm448_vm2 = vcmask 1045504   ;;  %vm441_vm3 = vcmask 48128  }
   0x8   :  { %64 = vrot.lane.b32.xlu2 %v1121_v2, %s1197_s26  ;;  %v1122_v4 = vld [vmem:[%s1548_s0 + $0x60] sm:$0xff]  ;;  %v1120_v5 = vld [vmem:[%s1548_s0 + $0x50] sm:$0xff]  ;;  %v1119_v6 = vld [vmem:[%s1548_s0 + $0x48] sm:$0xff]  ;;  %v97_v17 = vsel %vm95_vm1, %v91_v11, 0  ;;  %s1106_s8 = sshll.u32 %s1552_s4, 4  ;;  %vm1095_vm4 = vcmask 8192   ;;  %s1107_s8 = int_to_ptr.hbm [resolvable:$true] %s1106_s8 }
   0x9   :  { %v1118_v7 = vld [vmem:[%s1548_s0 + $0x40] sm:$0xff]  ;;  %v40_v9 = vld [vmem:[%s1548_s0 + $0x38] sm:$0xff]  ;;  %v38_v10 = vld [vmem:[%s1548_s0 + $0x28] sm:$0xff]  ;;  %v1277_v24 = vand.u32 4294901760, %v97_v17 }
   0xa   :  { %v36_v16 = vld [vmem:[%s1548_s0 + $0x18] sm:$0xff]  ;;  %v35_v20 = vld [vmem:[%s1548_s0 + $0x10] sm:$0xff]  ;;  %v37_v26 = vld [vmem:[%s1548_s0 + $0x20] sm:$0xff] }
   0xb   :  { %v39_v25 = vld [vmem:[%s1548_s0 + $0x30] sm:$0xff]  ;;  %v92_v30 = vld [vmem:[#allocation2 + $0x8] sm:$0xff]  ;;  %v1297_v35 = vsub.f32 %v97_v17, %v1277_v24  ;;  %v33_v51 = vld [vmem:[%s1548_s0] sm:$0xff] }
   0xc   :  { %v100_v42 = vsel %vm95_vm1, %v92_v30, 0  ;;  %v34_v50 = vld [vmem:[%s1548_s0 + $0x8] sm:$0xff]  ;;  %v93_v60 = vld [vmem:[#allocation2 + $0x10] sm:$0xff] }
   0xd   :  { %v134_v47 = vand.u32 4294901760, %v1297_v35  ;;  %v1324_v49 = vand.u32 4294901760, %v100_v42 }
   0xf   :  { %70 = vrot.lane.b32.xlu0 %v1124_v3, %s1197_s26  ;;  %66 = vrot.lane.b32.xlu1 %v1122_v4, %s1197_s26  ;;  %v135_v58 = vsub.f32 %v1297_v35, %v134_v47  ;;  %v1352_v0 = vsub.f32 %v100_v42, %v1324_v49 }
  0x10   :  { %62 = vrot.lane.b32.xlu2 %v1120_v5, %s1197_s26  ;;  %v103_v5 = vsel %vm95_vm1, %v93_v60, 0 }
  0x17   :  { %60 = vrot.lane.b32.xlu0 %v1119_v6, %s1197_s26  ;;  %58 = vrot.lane.b32.xlu1 %v1118_v7, %s1197_s26 }
  0x62   :  { %v65_v8 = vpop.permute.xlu2 %64 }
  0x63   :  { %v86_v23 = vsel %vm82_vm0, %v36_v16, %v65_v8  ;;  %v1378_v16 = vand.u32 4294901760, %v103_v5 }
  0x64   :  { %v1288_v29 = vand.u32 4294901760, %v86_v23 }
  0x66   :  { %v1309_v43 = vsub.f32 %v86_v23, %v1288_v29 }
  0x68   :  { %v199_v59 = vand.u32 4294901760, %v1309_v43 }
  0x6a   :  { %v63_v19 = vpop.permute.xlu2 %62 }
  0x6b   :  { %v85_v27 = vsel %vm82_vm0, %v35_v20, %v63_v19  ;;  %v94_v20 = vld [vmem:[#allocation2 + $0x18] sm:$0xff] }
  0x6c   :  { %v1301_v38 = vand.u32 4294901760, %v85_v27  ;;  %v106_v30 = vsel %vm95_vm1, %v94_v20, 0 }
  0x6e   :  { %v1321_v48 = vsub.f32 %v85_v27, %v1301_v38  ;;  %v149_v27 = vsub.f32 %v103_v5, %v1378_v16 }
  0x70   :  { %v205_v63 = vand.u32 4294901760, %v1321_v48 }
  0x72   :  { %v206_v11 = vsub.f32 %v1321_v48, %v205_v63 }
  0x74   :  { %v207_v23 = vand.u32 4294901760, %v206_v11 }
  0x79   :  { %v73_v12 = vpop.permute.xlu0 %72  ;;  %v69_v13 = vpop.permute.xlu1 %68 }
  0x7a   :  { %v90_v14 = vsel %vm82_vm0, %v40_v9, %v73_v12  ;;  %v88_v15 = vsel %vm82_vm0, %v38_v10, %v69_v13  ;;  %v200_v9 = vsub.f32 %v1309_v43, %v199_v59  ;;  %v136_v10 = vand.u32 4294901760, %v135_v58 }
  0x7b   :  { %v1264_v18 = vand.u32 4294901760, %v90_v14  ;;  %v1272_v22 = vand.u32 4294901760, %v88_v15  ;;  %v142_v12 = vand.u32 4294901760, %v1352_v0 }
  0x7c   :  { %v201_v17 = vand.u32 4294901760, %v200_v9 }
  0x7d   :  { %v1270_v21 = vsub.f32 %v90_v14, %v1264_v18  ;;  %117 = vmatpush.msra.mxu0 %v1264_v18  ;;  %300 = vmatpush.msra.mxu3 %v1264_v18  ;;  %v1291_v31 = vsub.f32 %v88_v15, %v1272_v22 }
  0x7f   :  { %248 = vmatpush.msra.mxu2 %v1270_v21  ;;  %v175_v28 = vand.u32 4294901760, %v1270_v21  ;;  %v187_v46 = vand.u32 4294901760, %v1291_v31 }
  0x81   :  { %v71_v32 = vpop.permute.xlu0 %70  ;;  %v67_v33 = vpop.permute.xlu1 %66  ;;  %v176_v34 = vsub.f32 %v1270_v21, %v175_v28  ;;  %v188_v57 = vsub.f32 %v1291_v31, %v187_v46 }
  0x82   :  { %v89_v36 = vsel %vm82_vm0, %v39_v25, %v71_v32  ;;  %v87_v37 = vsel %vm82_vm0, %v37_v26, %v67_v33  ;;  %v143_v26 = vsub.f32 %v1352_v0, %v142_v12 }
  0x83   :  { %v1303_v39 = vand.u32 4294901760, %v89_v36  ;;  %v1305_v40 = vand.u32 4294901760, %v87_v37  ;;  %v177_v41 = vand.u32 4294901760, %v176_v34  ;;  %v189_v8 = vand.u32 4294901760, %v188_v57 }
  0x84   :  { %v144_v34 = vand.u32 4294901760, %v143_v26 }
  0x85   :  { %v1312_v44 = vsub.f32 %v89_v36, %v1303_v39  ;;  %v1315_v45 = vsub.f32 %v87_v37, %v1305_v40  ;;  %119 = vmatpush.msra.mxu0 %v1303_v39  ;;  %178 = vmatpush.msra.mxu1 %v177_v41  ;;  %v150_v36 = vand.u32 4294901760, %v149_v27  ;;  %v156_v37 = vand.u32 4294901760, %v106_v30 }
  0x86   :  { %302 = vmatpush.msra.mxu3 %v1303_v39 }
  0x87   :  { %121 = vmatpush.msra.mxu0 %v1272_v22  ;;  %251 = vmatpush.msra.mxu2 %v1312_v44  ;;  %v181_v52 = vand.u32 4294901760, %v1312_v44  ;;  %v193_v53 = vand.u32 4294901760, %v1315_v45  ;;  %v151_v21 = vsub.f32 %v149_v27, %v150_v36 }
  0x88   :  { %304 = vmatpush.msra.mxu3 %v1272_v22 }
  0x89   :  { %v61_v54 = vpop.permute.xlu0 %60  ;;  %v59_v55 = vpop.permute.xlu1 %58  ;;  %123 = vmatpush.msra.mxu0 %v1305_v40  ;;  %254 = vmatpush.msra.mxu2 %v1291_v31  ;;  %v182_v56 = vsub.f32 %v1312_v44, %v181_v52  ;;  %v194_v4 = vsub.f32 %v1315_v45, %v193_v53  ;;  %v152_v31 = vand.u32 4294901760, %v151_v21 }
  0x8a   :  { %v84_v61 = vsel %vm82_vm0, %v34_v50, %v61_v54  ;;  %v83_v62 = vsel %vm82_vm0, %v33_v51, %v59_v55  ;;  %306 = vmatpush.msra.mxu3 %v1305_v40 }
  0x8b   :  { %v1354_v1 = vand.u32 4294901760, %v84_v61  ;;  %v1356_v2 = vand.u32 4294901760, %v83_v62  ;;  %125 = vmatpush.msra.mxu0 %v1288_v29  ;;  %257 = vmatpush.msra.mxu2 %v1315_v45  ;;  %v183_v3 = vand.u32 4294901760, %v182_v56  ;;  %v195_v13 = vand.u32 4294901760, %v194_v4 }
  0x8c   :  { %308 = vmatpush.msra.mxu3 %v1288_v29 }
  0x8d   :  { %v210_v6 = vsub.f32 %v84_v61, %v1354_v1  ;;  %v216_v7 = vsub.f32 %v83_v62, %v1356_v2  ;;  %127 = vmatpush.msra.mxu0 %v1301_v38  ;;  %184 = vmatpush.msra.mxu1 %v183_v3 }
  0x8e   :  { %260 = vmatpush.msra.mxu2 %v1309_v43  ;;  %310 = vmatpush.msra.mxu3 %v1301_v38 }
  0x8f   :  { %129 = vmatpush.msra.mxu0 %v1354_v1  ;;  %190 = vmatpush.msra.mxu1 %v189_v8  ;;  %v211_v14 = vand.u32 4294901760, %v210_v6  ;;  %v217_v15 = vand.u32 4294901760, %v216_v7 }
  0x90   :  { %263 = vmatpush.msra.mxu2 %v1321_v48  ;;  %312 = vmatpush.msra.mxu3 %v1354_v1 }
  0x91   :  { %131 = vmatpush.msra.mxu0 %v1356_v2  ;;  %196 = vmatpush.msra.mxu1 %v195_v13  ;;  %v212_v19 = vsub.f32 %v210_v6, %v211_v14  ;;  %v218_v25 = vsub.f32 %v216_v7, %v217_v15 }
  0x92   :  { %266 = vmatpush.msra.mxu2 %v210_v6  ;;  %314 = vmatpush.msra.mxu3 %v1356_v2 }
  0x93   :  { %137 = vmatmul.f32.vlgmr.msra.gmra.mxu0 %v136_v10  ;;  %202 = vmatpush.msra.mxu1 %v201_v17  ;;  %v213_v32 = vand.u32 4294901760, %v212_v19  ;;  %v219_v33 = vand.u32 4294901760, %v218_v25 }
  0x94   :  { %351 = vmatpush.msrb.mxu0 %v175_v28  ;;  %269 = vmatpush.msra.mxu2 %v216_v7  ;;  %v157_v28 = vsub.f32 %v106_v30, %v156_v37 }
  0x95   :  { %208 = vmatpush.msra.mxu1 %v207_v23  ;;  %272 = vmatmul.f32.vlgmr.msra.gmra.mxu2 %v1297_v35 }
  0x96   :  { %355 = vmatpush.msrb.mxu0 %v181_v52  ;;  %318 = vmatmul.f32.vlgmr.msra.gmra.mxu3 %v134_v47  ;;  %v158_v35 = vand.u32 4294901760, %v157_v28 }
  0x97   :  { %214 = vmatpush.msra.mxu1 %v213_v32 }
  0x98   :  { %359 = vmatpush.msrb.mxu0 %v187_v46 }
  0x99   :  { %220 = vmatpush.msra.mxu1 %v219_v33 }
  0x9a   :  { %363 = vmatpush.msrb.mxu0 %v193_v53  ;;  %222 = vmatmul.f32.vlgmr.msra.gmra.mxu1 %v1277_v24 }
  0x9b   :  { %145 = vmatmul.f32.gmra.mxu0 %v144_v34  ;;  %406 = vmatpush.msrb.mxu1 %v1264_v18  ;;  %v159_v18 = vsub.f32 %v157_v28, %v158_v35 }
  0x9c   :  { %367 = vmatpush.msrb.mxu0 %v199_v59 }
  0x9d   :  { %408 = vmatpush.msrb.mxu1 %v1303_v39  ;;  %277 = vmatmul.f32.gmra.mxu2 %v1352_v0  ;;  %v160_v39 = vand.u32 4294901760, %v159_v18 }
  0x9e   :  { %371 = vmatpush.msrb.mxu0 %v205_v63  ;;  %324 = vmatmul.f32.gmra.mxu3 %v142_v12 }
  0x9f   :  { %410 = vmatpush.msrb.mxu1 %v1272_v22 }
  0xa0   :  { %375 = vmatpush.msrb.mxu0 %v211_v14 }
  0xa1   :  { %412 = vmatpush.msrb.mxu1 %v1305_v40 }
  0xa2   :  { %379 = vmatpush.msrb.mxu0 %v217_v15  ;;  %226 = vmatmul.f32.gmra.mxu1 %v1324_v49 }
  0xa3   :  { %153 = vmatmul.f32.gmra.mxu0 %v152_v31  ;;  %414 = vmatpush.msrb.mxu1 %v1288_v29  ;;  %v438_v29 = vld [vmem:[%s1550_s2] sm:$0x3f] }
  0xa5   :  { %416 = vmatpush.msrb.mxu1 %v1301_v38  ;;  %282 = vmatmul.f32.gmra.mxu2 %v149_v27  ;;  %v450_v38 = vsel %vm448_vm2, %v438_v29, 0  ;;  %v637_v29 = vld [vmem:[%s1550_s2 + $0x40] sm:$0xff] }
  0xa6   :  { %330 = vmatmul.f32.gmra.mxu3 %v150_v36  ;;  %v467_v40 = vand.u32 4294901760, %v450_v38 }
  0xa7   :  { %418 = vmatpush.msrb.mxu1 %v1354_v1 }
  0xa8   :  { %468 = vmatpush.msrb.mxu2 %v467_v40  ;;  %v502_v45 = vsub.f32 %v450_v38, %v467_v40 }
  0xa9   :  { %420 = vmatpush.msrb.mxu1 %v1356_v2 }
  0xaa   :  { %230 = vmatmul.f32.gmra.mxu1 %v1378_v16  ;;  %v503_v47 = vand.u32 4294901760, %v502_v45  ;;  %533 = vmatpush.msra.mxu2 %v502_v45 }
  0xab   :  { %161 = vmatmul.f32.gmra.mxu0 %v160_v39  ;;  %619 = vmatpush.msra.mxu1 %v467_v40  ;;  %v638_v39 = vld [vmem:[%s1550_s2 + $0x48] sm:$0xff] }
  0xac   :  { %593 = vmatpush.msra.mxu0 %v503_v47 }
  0xad   :  { %287 = vmatmul.f32.gmra.mxu2 %v157_v28 }
  0xae   :  { %336 = vmatmul.f32.gmra.mxu3 %v158_v35 }
  0xb2   :  { %234 = vmatmul.f32.gmra.mxu1 %v156_v37 }
  0xb3   :  { %381 = vmatmul.f32.vlgmr.msrb.gmra.mxu0 %v1277_v24 }
  0xba   :  { %422 = vmatmul.f32.vlgmr.msrb.gmra.mxu1 %v1277_v24 }
  0xbb   :  { %385 = vmatmul.f32.gmra.mxu0 %v1324_v49 }
  0xc2   :  { %426 = vmatmul.f32.gmra.mxu1 %v1324_v49  ;;  %v504_v49 = vsub.f32 %v502_v45, %v503_v47 }
  0xc3   :  { %389 = vmatmul.f32.gmra.mxu0 %v1378_v16 }
  0xc4   :  { %v505_v51 = vand.u32 4294901760, %v504_v49  ;;  %v634_v49 = vld [vmem:[%s1550_s2 + $0x28] sm:$0xff] }
  0xc6   :  { %506 = vmatpush.msrb.mxu3 %v505_v51 }
  0xc8   :  { %561 = vmatpush.msra.mxu3 %v467_v40  ;;  %v1439_v40 = vand.u32 4294901760, %v637_v29 }
  0xca   :  { %430 = vmatmul.f32.gmra.mxu1 %v1378_v16 }
  0xcb   :  { %393 = vmatmul.f32.gmra.mxu0 %v156_v37 }
  0xd2   :  { %434 = vmatmul.f32.gmra.mxu1 %v156_v37 }
 0x110   :  { %v138_v22 = vpop.f32.mrf.mxu0 }
 0x117   :  { %v223_v24 = vpop.f32.mrf.mxu1 }
 0x118   :  { %v146_v41 = vpop.f32.mrf.mxu0  ;;  %v224_v42 = vadd.f32 %v223_v24, %v138_v22  ;;  %v273_v43 = vpop.f32.mrf.mxu2  ;;  %v1431_v22 = vand.u32 4294901760, %v638_v39  ;;  %v636_v24 = vld [vmem:[%s1550_s2 + $0x38] sm:$0xff] }
 0x119   :  { %v319_v44 = vpop.f32.mrf.mxu3 }
 0x11a   :  { %v274_v46 = vadd.f32 %v273_v43, %v224_v42  ;;  %v1437_v38 = vsub.f32 %v638_v39, %v1431_v22  ;;  %805 = vmatpush.msrb.mxu1 %v1431_v22  ;;  %v1448_v42 = vsub.f32 %v637_v29, %v1439_v40  ;;  %v1451_v43 = vand.u32 4294901760, %v636_v24 }
 0x11c   :  { %v320_v48 = vadd.f32 %v319_v44, %v274_v46  ;;  %763 = vmatpush.msrb.mxu0 %v1437_v38  ;;  %807 = vmatpush.msrb.mxu1 %v1439_v40  ;;  %v635_v44 = vld [vmem:[%s1550_s2 + $0x30] sm:$0xff]  ;;  %v704_v46 = vand.u32 4294901760, %v1448_v42  ;;  %v1463_v47 = vsub.f32 %v636_v24, %v1451_v43 }
 0x11e   :  { %766 = vmatpush.msrb.mxu0 %v1448_v42  ;;  %809 = vmatpush.msrb.mxu1 %v1451_v43  ;;  %v705_v51 = vsub.f32 %v1448_v42, %v704_v46 }
 0x11f   :  { %v227_v50 = vpop.f32.mrf.mxu1 }
 0x120   :  { %v154_v52 = vpop.f32.mrf.mxu0  ;;  %v228_v53 = vadd.f32 %v227_v50, %v146_v41  ;;  %v278_v54 = vpop.f32.mrf.mxu2  ;;  %v698_v41 = vand.u32 4294901760, %v1437_v38  ;;  %769 = vmatpush.msrb.mxu0 %v1463_v47 }
 0x121   :  { %v325_v55 = vpop.f32.mrf.mxu3 }
 0x122   :  { %v279_v56 = vadd.f32 %v278_v54, %v228_v53  ;;  %v699_v45 = vsub.f32 %v1437_v38, %v698_v41  ;;  %v1480_v54 = vand.u32 4294901760, %v634_v49 }
 0x124   :  { %v326_v57 = vadd.f32 %v325_v55, %v279_v56  ;;  %v700_v50 = vand.u32 4294901760, %v699_v45  ;;  %v633_v55 = vld [vmem:[%s1550_s2 + $0x20] sm:$0xff]  ;;  %v706_v56 = vand.u32 4294901760, %v705_v51 }
 0x127   :  { %v231_v58 = vpop.f32.mrf.mxu1 }
 0x128   :  { %v162_v59 = vpop.f32.mrf.mxu0  ;;  %v283_v3 = vpop.f32.mrf.mxu2  ;;  %v232_v4 = vadd.f32 %v231_v58, %v154_v52  ;;  %v710_v52 = vand.u32 4294901760, %v1463_v47 }
 0x129   :  { %v331_v5 = vpop.f32.mrf.mxu3 }
 0x12a   :  { %v284_v7 = vadd.f32 %v283_v3, %v232_v4  ;;  %v631_v4 = vld [vmem:[%s1550_s2 + $0x10] sm:$0xff] }
 0x12c   :  { %v332_v10 = vadd.f32 %v331_v5, %v284_v7 }
 0x12f   :  { %v235_v60 = vpop.f32.mrf.mxu1 }
 0x130   :  { %v382_v61 = vpop.f32.mrf.mxu0  ;;  %v236_v11 = vadd.f32 %v235_v60, %v162_v59  ;;  %v288_v12 = vpop.f32.mrf.mxu2  ;;  %v1487_v59 = vand.u32 4294901760, %v633_v55  ;;  %v721_v60 = vsub.f32 %v634_v49, %v1480_v54 }
 0x131   :  { %v383_v62 = vadd.f32 %v382_v61, %v320_v48  ;;  %v337_v17 = vpop.f32.mrf.mxu3  ;;  %v1466_v48 = vand.u32 4294901760, %v635_v44  ;;  %v632_v61 = vld [vmem:[%s1550_s2 + $0x18] sm:$0xff] }
 0x132   :  { %v289_v15 = vadd.f32 %v288_v12, %v236_v11  ;;  %v722_v3 = vand.u32 4294901760, %v721_v60 }
 0x133   :  { %v715_v53 = vsub.f32 %v635_v44, %v1466_v48  ;;  %811 = vmatpush.msrb.mxu1 %v1466_v48 }
 0x134   :  { %v338_v25 = vadd.f32 %v337_v17, %v289_v15 }
 0x135   :  { %v716_v58 = vand.u32 4294901760, %v715_v53  ;;  %772 = vmatpush.msrb.mxu0 %v715_v53  ;;  %813 = vmatpush.msrb.mxu1 %v1480_v54 }
 0x137   :  { %v423_v63 = vpop.f32.mrf.mxu1  ;;  %775 = vmatpush.msrb.mxu0 %v721_v60  ;;  %815 = vmatpush.msrb.mxu1 %v1487_v59 }
 0x138   :  { %v386_v0 = vpop.f32.mrf.mxu0  ;;  %v1422_v1 = vadd.f32 %v423_v63, %v383_v62  ;;  %v717_v63 = vsub.f32 %v715_v53, %v716_v58 }
 0x139   :  { %v387_v2 = vadd.f32 %v386_v0, %v326_v57  ;;  %v711_v57 = vsub.f32 %v1463_v47, %v710_v52  ;;  %v727_v0 = vsub.f32 %v633_v55, %v1487_v59 }
 0x13a   :  { %v718_v5 = vand.u32 4294901760, %v717_v63 }
 0x13b   :  { %v712_v62 = vand.u32 4294901760, %v711_v57  ;;  %778 = vmatpush.msrb.mxu0 %v727_v0 }
 0x13f   :  { %v427_v6 = vpop.f32.mrf.mxu1 }
 0x140   :  { %v1424_v8 = vadd.f32 %v427_v6, %v387_v2  ;;  %v390_v9 = vpop.f32.mrf.mxu0  ;;  %v667_v2 = vand.u32 4294901760, %v632_v61  ;;  %v728_v6 = vand.u32 4294901760, %v727_v0 }
 0x141   :  { %v391_v13 = vadd.f32 %v390_v9, %v332_v10  ;;  %v669_v9 = vand.u32 4294901760, %v631_v4  ;;  %v723_v10 = vsub.f32 %v721_v60, %v722_v3 }
 0x142   :  { %v733_v7 = vsub.f32 %v632_v61, %v667_v2  ;;  %817 = vmatpush.msrb.mxu1 %v667_v2  ;;  %v729_v12 = vsub.f32 %v727_v0, %v728_v6  ;;  %v1135_v61 = vld [vmem:[%s1550_s2 + $0x50] ss:$0 sm:$0xff] }
 0x143   :  { %v724_v15 = vand.u32 4294901760, %v723_v10 }
 0x144   :  { %781 = vmatpush.msrb.mxu0 %v733_v7  ;;  %819 = vmatpush.msrb.mxu1 %v669_v9 }
 0x147   :  { %v431_v14 = vpop.f32.mrf.mxu1 }
 0x148   :  { %v432_v16 = vadd.f32 %v431_v14, %v391_v13  ;;  %v394_v20 = vpop.f32.mrf.mxu0  ;;  %v734_v13 = vand.u32 4294901760, %v733_v7  ;;  %v739_v14 = vsub.f32 %v631_v4, %v669_v9 }
 0x149   :  { %v395_v27 = vadd.f32 %v394_v20, %v338_v25 }
 0x14a   :  { %v443_v19 = vsel %vm441_vm3, %v432_v16, 0  ;;  %v730_v16 = vand.u32 4294901760, %v729_v12  ;;  %v735_v17 = vsub.f32 %v733_v7, %v734_v13  ;;  %784 = vmatpush.msrb.mxu0 %v739_v14 }
 0x14b   :  { %v469_v23 = vand.u32 4294901760, %v443_v19 }
 0x14d   :  { %v470_v26 = vsub.f32 %v443_v19, %v469_v23  ;;  %508 = vmatmul.f32.vlgmr.msrb.gmra.mxu3 %v469_v23  ;;  %595 = vmatmul.f32.vlgmr.msra.gmra.mxu0 %v469_v23  ;;  %v740_v19 = vand.u32 4294901760, %v739_v14 }
 0x14e   :  { %621 = vmatmul.f32.vlgmr.msra.gmra.mxu1 %v469_v23  ;;  %701 = vmatpush.msrb.mxu3 %v700_v50  ;;  %v736_v23 = vand.u32 4294901760, %v735_v17 }
 0x14f   :  { %v435_v30 = vpop.f32.mrf.mxu1  ;;  %v471_v32 = vand.u32 4294901760, %v470_v26  ;;  %v741_v25 = vsub.f32 %v739_v14, %v740_v19 }
 0x150   :  { %v436_v33 = vadd.f32 %v435_v30, %v395_v27  ;;  %707 = vmatpush.msrb.mxu3 %v706_v56  ;;  %v1134_v30 = vld [vmem:[%s1550_s2 + $0x8] ss:$0 sm:$0xff] }
 0x151   :  { %v472_v34 = vsub.f32 %v470_v26, %v471_v32 }
 0x152   :  { %v446_v36 = vsel %vm441_vm3, %v436_v33, 0  ;;  %713 = vmatpush.msrb.mxu3 %v712_v62 }
 0x153   :  { %v477_v37 = vand.u32 4294901760, %v446_v36  ;;  %v473_v21 = vand.u32 4294901760, %v472_v34 }
 0x154   :  { %719 = vmatpush.msrb.mxu3 %v718_v5  ;;  %v932_v5 = vld [vmem:[%s1550_s2 + $0x68] sm:$0x3f] }
 0x155   :  { %v478_v28 = vsub.f32 %v446_v36, %v477_v37  ;;  %474 = vmatmul.f32.vlgmr.msrb.gmra.mxu2 %v473_v21  ;;  %512 = vmatmul.f32.gmra.mxu3 %v477_v37 }
 0x156   :  { %599 = vmatmul.f32.gmra.mxu0 %v477_v37  ;;  %625 = vmatmul.f32.gmra.mxu1 %v477_v37 }
 0x157   :  { %v479_v31 = vand.u32 4294901760, %v478_v28  ;;  %656 = vmatpush.msrb.mxu2 %v1431_v22  ;;  %725 = vmatpush.msrb.mxu3 %v724_v15 }
 0x159   :  { %v480_v35 = vsub.f32 %v478_v28, %v479_v31  ;;  %658 = vmatpush.msrb.mxu2 %v1439_v40  ;;  %731 = vmatpush.msrb.mxu3 %v730_v16 }
 0x15b   :  { %v481_v18 = vand.u32 4294901760, %v480_v35  ;;  %660 = vmatpush.msrb.mxu2 %v1451_v43  ;;  %737 = vmatpush.msrb.mxu3 %v736_v23 }
 0x15d   :  { %482 = vmatmul.f32.gmra.mxu2 %v481_v18  ;;  %565 = vmatmul.f32.vlgmr.msra.gmra.mxu3 %v471_v32 }
 0x15e   :  { %662 = vmatpush.msrb.mxu2 %v1466_v48 }
 0x160   :  { %664 = vmatpush.msrb.mxu2 %v1480_v54 }
 0x162   :  { %666 = vmatpush.msrb.mxu2 %v1487_v59 }
 0x164   :  { %668 = vmatpush.msrb.mxu2 %v667_v2 }
 0x165   :  { %536 = vmatmul.f32.vlgmr.msra.gmra.mxu2 %v470_v26  ;;  %571 = vmatmul.f32.gmra.mxu3 %v479_v31  ;;  %v742_v26 = vand.u32 4294901760, %v741_v25 }
 0x166   :  { %670 = vmatpush.msrb.mxu2 %v669_v9 }
 0x167   :  { %743 = vmatpush.msrb.mxu3 %v742_v26 }
 0x168   :  { %844 = vmatpush.msra.mxu2 %v698_v41 }
 0x169   :  { %891 = vmatpush.msra.mxu3 %v1431_v22 }
 0x16a   :  { %848 = vmatpush.msra.mxu2 %v704_v46 }
 0x16b   :  { %893 = vmatpush.msra.mxu3 %v1439_v40 }
 0x16c   :  { %852 = vmatpush.msra.mxu2 %v710_v52 }
 0x16d   :  { %541 = vmatmul.f32.gmra.mxu2 %v478_v28  ;;  %895 = vmatpush.msra.mxu3 %v1451_v43 }
 0x16e   :  { %856 = vmatpush.msra.mxu2 %v716_v58 }
 0x16f   :  { %897 = vmatpush.msra.mxu3 %v1466_v48 }
 0x170   :  { %860 = vmatpush.msra.mxu2 %v722_v3 }
 0x171   :  { %899 = vmatpush.msra.mxu3 %v1480_v54 }
 0x172   :  { %864 = vmatpush.msra.mxu2 %v728_v6  ;;  %v943_v6 = vsel %vm448_vm2, %v932_v5, 0 }
 0x173   :  { %901 = vmatpush.msra.mxu3 %v1487_v59  ;;  %v960_v7 = vand.u32 4294901760, %v943_v6 }
 0x174   :  { %868 = vmatpush.msra.mxu2 %v734_v13 }
 0x175   :  { %903 = vmatpush.msra.mxu3 %v667_v2  ;;  %v987_v12 = vsub.f32 %v943_v6, %v960_v7  ;;  %961 = vmatpush.msra.mxu0 %v960_v7 }
 0x176   :  { %872 = vmatpush.msra.mxu2 %v740_v19 }
 0x177   :  { %905 = vmatpush.msra.mxu3 %v669_v9  ;;  %v988_v13 = vand.u32 4294901760, %v987_v12 }
 0x179   :  { %v989_v19 = vsub.f32 %v987_v12, %v988_v13 }
 0x17b   :  { %v990_v25 = vand.u32 4294901760, %v989_v19 }
 0x17d   :  { %991 = vmatpush.msra.mxu1 %v990_v25 }
 0x1ca   :  { %v596_v28 = vpop.f32.mrf.mxu0 }
 0x1cb   :  { %v622_v18 = vpop.f32.mrf.mxu1 }
 0x1d0   :  { %v509_v11 = vpop.f32.mrf.mxu3 }
 0x1d3   :  { %v600_v42 = vpop.f32.mrf.mxu0  ;;  %v626_v44 = vpop.f32.mrf.mxu1 }
 0x1d8   :  { %v475_v20 = vpop.f32.mrf.mxu2  ;;  %v513_v27 = vpop.f32.mrf.mxu3 }
 0x1d9   :  { %v476_v33 = vadd.f32 %v1134_v30, %v475_v20 }
 0x1db   :  { %v510_v34 = vadd.f32 %v509_v11, %v476_v33 }
 0x1e0   :  { %v483_v32 = vpop.f32.mrf.mxu2  ;;  %v566_v36 = vpop.f32.mrf.mxu3 }
 0x1e1   :  { %v484_v31 = vadd.f32 %v1134_v30, %v483_v32 }
 0x1e3   :  { %v514_v29 = vadd.f32 %v513_v27, %v484_v31 }
 0x1e8   :  { %v537_v37 = vpop.f32.mrf.mxu2  ;;  %v572_v24 = vpop.f32.mrf.mxu3 }
 0x1e9   :  { %v538_v21 = vadd.f32 %v537_v37, %v510_v34  ;;  %v919_v37 = vld [vmem:[%s1550_s2 + $0x58] sm:$0xff] }
 0x1eb   :  { %v567_v35 = vadd.f32 %v566_v36, %v538_v21 }
 0x1ed   :  { %v597_v39 = vadd.f32 %v596_v28, %v567_v35 }
 0x1ef   :  { %v623_v22 = vadd.f32 %v622_v18, %v597_v39 }
 0x1f0   :  { %v542_v38 = vpop.f32.mrf.mxu2 }
 0x1f1   :  { %1136 = vtanh.f32 %v623_v22  ;;  %v543_v40 = vadd.f32 %v542_v38, %v514_v29  ;;  %v933_v38 = vld [vmem:[%s1550_s2 + $0x70] sm:$0x1] }
 0x1f3   :  { %v573_v41 = vadd.f32 %v572_v24, %v543_v40  ;;  %v1198_v24 = vmov 0  }
 0x1f4   :  { %1132 = vset.pattern.permute.xlu2 %v1198_v24  ;;  %1133 = vset.pattern.permute.xlu0 %v1198_v24 }
 0x1f5   :  { %v601_v43 = vadd.f32 %v600_v42, %v573_v41  ;;  %936 = vperm.xlu2 %1132, %v933_v38  }
 0x1f7   :  { %v1137_v45 = vpop.eup %1136  ;;  %v627_v46 = vadd.f32 %v626_v44, %v601_v43 }
 0x1f8   :  { %v642_v47 = vsel %vm95_vm1, %v1137_v45, 0 }
 0x1f9   :  { %1138 = vtanh.f32 %v627_v46  ;;  %v671_v48 = vand.u32 4294901760, %v642_v47 }
 0x1fb   :  { %745 = vmatmul.f32.vlgmr.msrb.gmra.mxu3 %v671_v48  ;;  %v672_v49 = vsub.f32 %v642_v47, %v671_v48 }
 0x1fc   :  { %1037 = vmatpush.msrb.mxu3 %v960_v7 }
 0x1fd   :  { %787 = vmatmul.f32.vlgmr.msrb.gmra.mxu0 %v672_v49  ;;  %v673_v50 = vand.u32 4294901760, %v672_v49 }
 0x1fe   :  { %1063 = vmatpush.msrb.mxu0 %v988_v13 }
 0x1ff   :  { %v1139_v51 = vpop.eup %1138  ;;  %823 = vmatmul.f32.vlgmr.msrb.gmra.mxu1 %v673_v50  ;;  %v674_v52 = vsub.f32 %v672_v49, %v673_v50 }
 0x200   :  { %v645_v53 = vsel %vm95_vm1, %v1139_v51, 0  ;;  %1085 = vmatpush.msrb.mxu1 %v960_v7 }
 0x201   :  { %v675_v54 = vand.u32 4294901760, %v674_v52  ;;  %v679_v55 = vand.u32 4294901760, %v645_v53 }
 0x203   :  { %676 = vmatmul.f32.vlgmr.msrb.gmra.mxu2 %v675_v54  ;;  %749 = vmatmul.f32.gmra.mxu3 %v679_v55  ;;  %v680_v56 = vsub.f32 %v645_v53, %v679_v55 }
 0x204   :  { %1014 = vmatpush.msrb.mxu2 %v987_v12 }
 0x205   :  { %792 = vmatmul.f32.gmra.mxu0 %v680_v56  ;;  %v681_v57 = vand.u32 4294901760, %v680_v56 }
 0x207   :  { %829 = vmatmul.f32.gmra.mxu1 %v681_v57  ;;  %v682_v58 = vsub.f32 %v680_v56, %v681_v57 }
 0x209   :  { %v683_v59 = vand.u32 4294901760, %v682_v58 }
 0x20b   :  { %684 = vmatmul.f32.gmra.mxu2 %v683_v59  ;;  %907 = vmatmul.f32.vlgmr.msra.gmra.mxu3 %v671_v48 }
 0x213   :  { %874 = vmatmul.f32.vlgmr.msra.gmra.mxu2 %v671_v48  ;;  %911 = vmatmul.f32.gmra.mxu3 %v679_v55 }
 0x21b   :  { %878 = vmatmul.f32.gmra.mxu2 %v679_v55 }
 0x24f   :  { %v937_v51 = vpop.permute.xlu2 %936 }
 0x27a   :  { %v788_v3 = vpop.f32.mrf.mxu0 }
 0x27c   :  { %v824_v11 = vpop.f32.mrf.mxu1 }
 0x27e   :  { %v746_v60 = vpop.f32.mrf.mxu3 }
 0x282   :  { %v793_v23 = vpop.f32.mrf.mxu0 }
 0x284   :  { %v830_v32 = vpop.f32.mrf.mxu1 }
 0x286   :  { %v677_v62 = vpop.f32.mrf.mxu2  ;;  %v750_v0 = vpop.f32.mrf.mxu3 }
 0x287   :  { %v678_v63 = vadd.f32 %v1135_v61, %v677_v62 }
 0x289   :  { %v747_v2 = vadd.f32 %v746_v60, %v678_v63 }
 0x28b   :  { %v789_v10 = vadd.f32 %v788_v3, %v747_v2 }
 0x28d   :  { %v825_v15 = vadd.f32 %v824_v11, %v789_v10 }
 0x28e   :  { %v685_v4 = vpop.f32.mrf.mxu2  ;;  %v908_v16 = vpop.f32.mrf.mxu3 }
 0x28f   :  { %v686_v9 = vadd.f32 %v1135_v61, %v685_v4 }
 0x291   :  { %v751_v14 = vadd.f32 %v750_v0, %v686_v9 }
 0x293   :  { %v794_v27 = vadd.f32 %v793_v23, %v751_v14 }
 0x295   :  { %v831_v33 = vadd.f32 %v830_v32, %v794_v27 }
 0x296   :  { %v875_v17 = vpop.f32.mrf.mxu2  ;;  %v912_v21 = vpop.f32.mrf.mxu3 }
 0x297   :  { %v876_v20 = vadd.f32 %v875_v17, %v825_v15 }
 0x299   :  { %v909_v26 = vadd.f32 %v908_v16, %v876_v20 }
 0x29b   :  { %v915_v30 = vadd.f32 %v909_v26, %v1422_v1  ;;  %v920_v1 = vld [vmem:[%s1550_s2 + $0x60] sm:$0xff]  ;;  %s1199_s2 = smov [#allocation5]  }
 0x29d   :  { %917 = vst.msk [vmem:[%s1551_s3] sm:$0xff] %vm441_vm3, %v915_v30  ;;  %v921_v31 = vmul.f32 %v919_v37, %v915_v30 }
 0x29e   :  { %v879_v34 = vpop.f32.mrf.mxu2 }
 0x29f   :  { %v880_v36 = vadd.f32 %v879_v34, %v831_v33  ;;  %v923_v39 = vsel %vm441_vm3, %v921_v31, 0.0 }
 0x2a1   :  { %v913_v28 = vadd.f32 %v912_v21, %v880_v36 }
 0x2a3   :  { %v916_v35 = vadd.f32 %v913_v28, %v1424_v8 }
 0x2a5   :  { %918 = vst.msk [vmem:[%s1551_s3 + $0x8] sm:$0xff] %vm441_vm3, %v916_v35  ;;  %v922_v18 = vmul.f32 %v920_v1, %v916_v35  ;;  %s1104_s3 = sshll.u32 %s1199_s2, 4  ;;  %s1105_s3 = int_to_ptr.vmem [resolvable:$true] %s1104_s3 }
 0x2a7   :  { %v924_v22 = vsel %vm441_vm3, %v922_v18, 0.0 }
 0x2a8   :  { %v925_v29 = vadd.f32 %v924_v22, %v923_v39 }
 0x2aa   :  { %v926_v40 = vrot.slane %v925_v29, 4 }
 0x2ac   :  { %v927_v8 = vadd.f32 %v926_v40, %v925_v29 }
 0x2ae   :  { %v928_v41 = vrot.slane %v927_v8, 2 }
 0x2b0   :  { %v929_v42 = vadd.f32 %v928_v41, %v927_v8 }
 0x2b2   :  { %v930_v43 = vrot.slane %v929_v42, 1 }
 0x2b4   :  { %v931_v44 = vadd.f32 %v930_v43, %v929_v42 }
 0x2b6   :  { %v940_v45 = vsel %vm441_vm3, %v931_v44, 0 }
 0x2b7   :  { %v962_v46 = vand.u32 4294901760, %v940_v45 }
 0x2b9   :  { %993 = vmatmul.f32.vlgmr.msra.gmra.mxu1 %v962_v46  ;;  %v963_v47 = vsub.f32 %v940_v45, %v962_v46 }
 0x2bb   :  { %1017 = vmatmul.f32.vlgmr.msrb.gmra.mxu2 %v963_v47  ;;  %v964_v48 = vand.u32 4294901760, %v963_v47 }
 0x2bd   :  { %1041 = vmatmul.f32.vlgmr.msrb.gmra.mxu3 %v964_v48  ;;  %v965_v49 = vsub.f32 %v963_v47, %v964_v48 }
 0x2bf   :  { %v966_v50 = vand.u32 4294901760, %v965_v49 }
 0x2c1   :  { %967 = vmatmul.f32.vlgmr.msra.gmra.mxu0 %v966_v50  ;;  %1087 = vmatmul.f32.vlgmr.msrb.gmra.mxu1 %v962_v46 }
 0x2c9   :  { %1065 = vmatmul.f32.vlgmr.msrb.gmra.mxu0 %v962_v46 }
 0x336   :  { %v994_v52 = vpop.f32.mrf.mxu1 }
 0x33e   :  { %v968_v53 = vpop.f32.mrf.mxu0  ;;  %v1018_v56 = vpop.f32.mrf.mxu2 }
 0x33f   :  { %v969_v54 = vadd.f32 %v968_v53, %v937_v51  ;;  %v1088_v62 = vpop.f32.mrf.mxu1 }
 0x340   :  { %v1042_v58 = vpop.f32.mrf.mxu3 }
 0x341   :  { %v995_v55 = vadd.f32 %v994_v52, %v969_v54 }
 0x343   :  { %v1019_v57 = vadd.f32 %v1018_v56, %v995_v55 }
 0x345   :  { %v1043_v59 = vadd.f32 %v1042_v58, %v1019_v57 }
 0x346   :  { %v1066_v60 = vpop.f32.mrf.mxu0 }
 0x347   :  { %v1067_v61 = vadd.f32 %v1066_v60, %v1043_v59 }
 0x349   :  { %v1089_v63 = vadd.f32 %v1088_v62, %v1067_v61 }
 0x34b   :  { %v1091_v0 = vmul.f32 0.5, %v1089_v63 }
 0x34d   :  { %1140 = vtanh.f32 %v1091_v0 }
 0x353   :  { %v1141_v2 = vpop.eup %1140 }
 0x354   :  { %v1093_v3 = vadd.f32 1.0, %v1141_v2 }
 0x356   :  { %v1094_v4 = vmul.f32 0.5, %v1093_v3 }
 0x358   :  { %1096 = vst.msk [vmem:[#allocation5] sm:$0x1] %vm1095_vm4, %v1094_v4 }
 0x359   :  { %1109 = dma.vmem_to_hbm [thread:$0]  %s1105_s3, 16, %s1107_s8, [#allocation4]  }
 0x35a   :  { %1192 = dma.done.wait [#allocation4], 16  }
 0x35b   :  { %1193 = vsyncadd [#allocation4], 4294967280 }
 0x35c   :  { %1116 = vsyncpa [#allocation3], 1 }
 0x35d   :  { %1117 = vsyncpa [#allocation4], 1 }

</bundles_post_ra>
